<compile_context>
chip_gen: v7x
topology: tpu7x:2x2x1
jax: 0.10.0
libtpu: 0.0.40
codegen_flags: <defaults>
</compile_context>

<pallas_src>
import functools
import math

import jax
import jax.numpy as jnp
from jax import lax
from jax.experimental import pallas as pl
from jax.experimental.pallas import tpu as pltpu

EPS = 1e-5


def _mm(a, b):
    # (m, k) @ (k, n) on the MXU with f32 accumulation.
    return lax.dot_general(a, b, (((1,), (0,)), ((), ())),
                           preferred_element_type=jnp.float32)


def _mm_bt(a, b):
    # (m, k) @ (n, k)^T without an explicit transpose.
    return lax.dot_general(a, b, (((1,), (1,)), ((), ())),
                           preferred_element_type=jnp.float32)


def _block_kernel(x_ref, cos_ref, sin_ref,
                  wq_ref, wk_ref, wv_ref, wo_ref,
                  g1_ref, g2_ref, w1_ref, w3_ref, w2_ref,
                  o_ref, *, n_heads, head_dim):
    S = x_ref.shape[1]
    D = x_ref.shape[2]
    half = head_dim // 2
    scale = 1.0 / math.sqrt(head_dim)

    x = x_ref[0].astype(jnp.float32)                              # (S, D) f32

    # ---- RMSNorm 1 (f32 VPU; rsqrt on EUP) ----
    inv_rms1 = lax.rsqrt(jnp.mean(x * x, axis=-1, keepdims=True) + EPS)
    h_bf = ((x * inv_rms1) * g1_ref[...]).astype(jnp.bfloat16)    # bf16 matmul operand

    cos2 = cos_ref[0]                                             # (S, Dh) f32, [evens|odds] layout
    sin2 = sin_ref[0]

    # causal mask (diagonal always unmasked -> row max finite)
    row = lax.broadcasted_iota(jnp.int32, (S, S), 0)
    col = lax.broadcasted_iota(jnp.int32, (S, S), 1)
    causal = col <= row

    def _rope(u):                                                 # u: (S, Dh) f32, half layout
        rot = jnp.concatenate([-u[:, half:], u[:, :half]], axis=1)
        return u * cos2 + rot * sin2

    def _head(hd, acc):
        # Per-head projections straight from head-major weight blocks (no activation slicing).
        qh = _mm(h_bf, wq_ref[hd])                                # (S, Dh) f32
        kh = _mm(h_bf, wk_ref[hd])
        vh = _mm(h_bf, wv_ref[hd])
        qh = _rope(qh).astype(jnp.bfloat16)
        kh = _rope(kh).astype(jnp.bfloat16)

        scores = _mm_bt(qh, kh) * scale                           # (S, S) f32
        scores = jnp.where(causal, scores, -jnp.inf)
        m = jnp.max(scores, axis=-1, keepdims=True)
        p = jnp.exp(scores - m)
        p = p * pl.reciprocal(jnp.sum(p, axis=-1, keepdims=True), approx=True)

        hv = _mm(p.astype(jnp.bfloat16), vh.astype(jnp.bfloat16))  # (S, Dh) f32
        # accumulate directly through this head's slice of Wo (no concat of head outputs)
        return acc + _mm(hv.astype(jnp.bfloat16), wo_ref[hd])      # (S, D) f32

    attn = lax.fori_loop(0, n_heads, _head, jnp.zeros((S, D), jnp.float32))

    x = x + attn                                                  # residual 1

    # ---- RMSNorm 2 + SwiGLU ----
    inv_rms2 = lax.rsqrt(jnp.mean(x * x, axis=-1, keepdims=True) + EPS)
    h2_bf = ((x * inv_rms2) * g2_ref[...]).astype(jnp.bfloat16)

    a = _mm(h2_bf, w1_ref[...])                                   # (S, F) f32
    b = _mm(h2_bf, w3_ref[...])
    gated = (a * jax.nn.sigmoid(a) * b).astype(jnp.bfloat16)
    ff = _mm(gated, w2_ref[...])                                  # (S, D) f32

    o_ref[0] = (x + ff).astype(o_ref.dtype)                       # residual 2


def _rope_tables(token_positions, head_dim, theta):
    """(B, S, head_dim) cos/sin tables in the de-interleaved ([evens | odds]) layout."""
    inv_freq = theta ** (-(2.0 * jnp.arange(head_dim // 2, dtype=jnp.float32)) / head_dim)
    ang = token_positions.astype(jnp.float32)[..., None] * inv_freq     # (B, S, Dh/2)
    cos = jnp.cos(ang)
    sin = jnp.sin(ang)
    return (jnp.concatenate([cos, cos], axis=-1),
            jnp.concatenate([sin, sin], axis=-1))


def prepare_params(params, *, n_heads, compute_dtype=jnp.bfloat16):
    """One-time layout prep (outside the per-call path): transpose torch (out,in) weights to
    (in,out), split Q/K/V/O head-major, de-interleave Q/K columns for rotate-half RoPE, and
    cast matmul weights to bf16.  Norm gains stay f32."""
    D = params["wq"].shape[1]
    Dh = D // n_heads
    # per-head column permutation: interleaved (0,1,2,3,...) -> [0,2,4,...,Dh-2, 1,3,...,Dh-1]
    perm = jnp.concatenate([jnp.arange(0, Dh, 2), jnp.arange(1, Dh, 2)])

    def qk_heads(w):                                   # torch layout (out=D, in=D)
        wt = w.T.reshape(D, n_heads, Dh).transpose(1, 0, 2)      # (H, D_in, Dh)
        return wt[:, :, perm].astype(compute_dtype)

    def v_heads(w):
        return w.T.reshape(D, n_heads, Dh).transpose(1, 0, 2).astype(compute_dtype)

    return {
        "wq": qk_heads(params["wq"]),                            # (H, D, Dh) bf16
        "wk": qk_heads(params["wk"]),
        "wv": v_heads(params["wv"]),
        "wo": params["wo"].T.reshape(n_heads, Dh, D).astype(compute_dtype),   # (H, Dh, D)
        "w1": params["w1"].T.astype(compute_dtype),              # (D, F)
        "w3": params["w3"].T.astype(compute_dtype),              # (D, F)
        "w2": params["w2"].T.astype(compute_dtype),              # (F, D)
        "g1": params["g1"].reshape(1, D).astype(jnp.float32),
        "g2": params["g2"].reshape(1, D).astype(jnp.float32),
    }


def transformer_block(x, token_positions, prepared, *, n_heads, theta):
    B, S, D = x.shape
    Dh = D // n_heads
    F = prepared["w1"].shape[1]

    cos2, sin2 = _rope_tables(token_positions, Dh, theta)

    kernel = functools.partial(_block_kernel, n_heads=n_heads, head_dim=Dh)
    batched = lambda b: (b, 0, 0)
    fixed3 = lambda b: (0, 0, 0)
    fixed2 = lambda b: (0, 0)

    return pl.pallas_call(
        kernel,
        out_shape=jax.ShapeDtypeStruct((B, S, D), x.dtype),
        grid=(B,),
        in_specs=[
            pl.BlockSpec((1, S, D), batched),          # x
            pl.BlockSpec((1, S, Dh), batched),         # cos (half layout)
            pl.BlockSpec((1, S, Dh), batched),         # sin
            pl.BlockSpec((n_heads, D, Dh), fixed3),    # Wq  (head-major, bf16)
            pl.BlockSpec((n_heads, D, Dh), fixed3),    # Wk
            pl.BlockSpec((n_heads, D, Dh), fixed3),    # Wv
            pl.BlockSpec((n_heads, Dh, D), fixed3),    # Wo
            pl.BlockSpec((1, D), fixed2),              # norm1 gain (f32)
            pl.BlockSpec((1, D), fixed2),              # norm2 gain (f32)
            pl.BlockSpec((D, F), fixed2),              # W1^T (bf16)
            pl.BlockSpec((D, F), fixed2),              # W3^T (bf16)
            pl.BlockSpec((F, D), fixed2),              # W2^T (bf16)
        ],
        out_specs=pl.BlockSpec((1, S, D), batched),
        compiler_params=pltpu.CompilerParams(
            dimension_semantics=("parallel",),
            vmem_limit_bytes=32 * 1024 * 1024,
        ),
    )(x, cos2, sin2,
      prepared["wq"], prepared["wk"], prepared["wv"], prepared["wo"],
      prepared["g1"], prepared["g2"],
      prepared["w1"], prepared["w3"], prepared["w2"])


# ---------------- pure-JAX reference (independent formulation, same bf16 MXU policy) ----------
def reference_block(x, token_positions, params, *, n_heads, theta):
    B, S, D = x.shape
    Dh = D // n_heads

    def mmr(a, b):  # bf16 operands, f32 accumulation (mirrors the kernel's MXU dtype policy)
        return jnp.dot(a.astype(jnp.bfloat16), b.astype(jnp.bfloat16),
                       preferred_element_type=jnp.float32)

    def rmsnorm(v, g):
        return v * lax.rsqrt(jnp.mean(v * v, axis=-1, keepdims=True) + EPS) * g

    def rope(xh):  # (B, S, H, Dh), interleaved-pair formulation
        inv_freq = theta ** (-(2.0 * jnp.arange(Dh // 2, dtype=jnp.float32)) / Dh)
        ang = token_positions.astype(jnp.float32)[..., None] * inv_freq
        c = jnp.cos(ang)[:, :, None, :]
        s = jnp.sin(ang)[:, :, None, :]
        xe, xo = xh[..., 0::2], xh[..., 1::2]
        return jnp.stack([xe * c - xo * s, xe * s + xo * c], axis=-1).reshape(xh.shape)

    residual = x
    h = rmsnorm(x, params["g1"])
    q = mmr(h, params["wq"].T).reshape(B, S, n_heads, Dh)
    k = mmr(h, params["wk"].T).reshape(B, S, n_heads, Dh)
    v = mmr(h, params["wv"].T).reshape(B, S, n_heads, Dh)
    q, k = rope(q), rope(k)
    scores = jnp.einsum("bshd,bthd->bhst", q.astype(jnp.bfloat16), k.astype(jnp.bfloat16),
                        preferred_element_type=jnp.float32) / math.sqrt(Dh)
    mask = jnp.tril(jnp.ones((S, S), bool))
    scores = jnp.where(mask, scores, -jnp.inf)
    p = jax.nn.softmax(scores, axis=-1)
    attn = jnp.einsum("bhst,bthd->bshd", p.astype(jnp.bfloat16), v.astype(jnp.bfloat16),
                      preferred_element_type=jnp.float32).reshape(B, S, D)
    attn = mmr(attn, params["wo"].T)
    x = attn + residual

    residual = x
    h2 = rmsnorm(x, params["g2"])
    a = mmr(h2, params["w1"].T)
    b = mmr(h2, params["w3"].T)
    ff = mmr(a * jax.nn.sigmoid(a) * b, params["w2"].T)
    return ff + residual


if __name__ == "__main__":
    B, S, D, H, F = 2, 8, 32, 4, 64
    theta = 10000.0

    key = jax.random.PRNGKey(0)
    ks = jax.random.split(key, 8)
    std_dd = (2.0 / (D + D)) ** 0.5
    std_df = (2.0 / (D + F)) ** 0.5
    params = {
        "wq": jax.random.normal(ks[0], (D, D), jnp.float32) * std_dd,
        "wk": jax.random.normal(ks[1], (D, D), jnp.float32) * std_dd,
        "wv": jax.random.normal(ks[2], (D, D), jnp.float32) * std_dd,
        "wo": jax.random.normal(ks[3], (D, D), jnp.float32) * std_dd,
        "w1": jax.random.normal(ks[4], (F, D), jnp.float32) * std_df,
        "w3": jax.random.normal(ks[5], (F, D), jnp.float32) * std_df,
        "w2": jax.random.normal(ks[6], (D, F), jnp.float32) * std_df,
        "g1": jnp.ones((D,), jnp.float32),
        "g2": jnp.ones((D,), jnp.float32),
    }

    x = jax.random.normal(ks[7], (B, S, D), jnp.float32)
    token_positions = jnp.broadcast_to(jnp.arange(S, dtype=jnp.int32)[None, :], (B, S))

    # One-time layout prep (transpose / head-split / bf16 cast) -- outside the per-call path.
    prepared = prepare_params(params, n_heads=H)

    out = transformer_block(x, token_positions, prepared, n_heads=H, theta=theta)
    out = jax.block_until_ready(out)

    ref = reference_block(x, token_positions, params, n_heads=H, theta=theta)
    assert out.shape == (B, S, D) and out.dtype == x.dtype
    err = float(jnp.max(jnp.abs(out - ref)))
    # bf16 matmul operands + approx-reciprocal softmax => compare at bf16-level tolerance.
    assert jnp.allclose(out, ref, atol=2e-2, rtol=2e-2), f"mismatch vs reference (max abs err={err:.4g})"

    print("KERNEL_OK")
</pallas_src>

<mosaic_0001>
module attributes {stable_mosaic.version = 11 : i64} {
  func.func @_block_kernel(%arg0: i32, %arg1: memref<1x8x32xf32, #tpu.memory_space<vmem>>, %arg2: memref<1x8x8xf32, #tpu.memory_space<vmem>>, %arg3: memref<1x8x8xf32, #tpu.memory_space<vmem>>, %arg4: memref<4x32x8xbf16, #tpu.memory_space<vmem>>, %arg5: memref<4x32x8xbf16, #tpu.memory_space<vmem>>, %arg6: memref<4x32x8xbf16, #tpu.memory_space<vmem>>, %arg7: memref<4x8x32xbf16, #tpu.memory_space<vmem>>, %arg8: memref<1x32xf32, #tpu.memory_space<vmem>>, %arg9: memref<1x32xf32, #tpu.memory_space<vmem>>, %arg10: memref<32x64xbf16, #tpu.memory_space<vmem>>, %arg11: memref<32x64xbf16, #tpu.memory_space<vmem>>, %arg12: memref<64x32xbf16, #tpu.memory_space<vmem>>, %arg13: memref<1x8x32xf32, #tpu.memory_space<vmem>>) attributes {dimension_semantics = [#tpu.dimension_semantics<parallel>], iteration_bounds = array<i64: 2>, scalar_prefetch = 0 : i64, scratch_operands = 0 : i64, tpu.core_type = #tpu.core_type<tc>, window_params = [{transform_indices = @transform_0, window_bounds = array<i64: 1, 8, 32>}, {transform_indices = @transform_1, window_bounds = array<i64: 1, 8, 8>}, {transform_indices = @transform_2, window_bounds = array<i64: 1, 8, 8>}, {pipeline_mode = #tpu.pipeline_mode<synchronous>, transform_indices = @transform_3, window_bounds = array<i64: 4, 32, 8>}, {pipeline_mode = #tpu.pipeline_mode<synchronous>, transform_indices = @transform_4, window_bounds = array<i64: 4, 32, 8>}, {pipeline_mode = #tpu.pipeline_mode<synchronous>, transform_indices = @transform_5, window_bounds = array<i64: 4, 32, 8>}, {pipeline_mode = #tpu.pipeline_mode<synchronous>, transform_indices = @transform_6, window_bounds = array<i64: 4, 8, 32>}, {pipeline_mode = #tpu.pipeline_mode<synchronous>, transform_indices = @transform_7, window_bounds = array<i64: 1, 32>}, {pipeline_mode = #tpu.pipeline_mode<synchronous>, transform_indices = @transform_8, window_bounds = array<i64: 1, 32>}, {pipeline_mode = #tpu.pipeline_mode<synchronous>, transform_indices = @transform_9, window_bounds = array<i64: 32, 64>}, {pipeline_mode = #tpu.pipeline_mode<synchronous>, transform_indices = @transform_10, window_bounds = array<i64: 32, 64>}, {pipeline_mode = #tpu.pipeline_mode<synchronous>, transform_indices = @transform_11, window_bounds = array<i64: 64, 32>}, {transform_indices = @transform_12, window_bounds = array<i64: 1, 8, 32>}]} {
    %c0 = arith.constant 0 : index
    %c0_0 = arith.constant 0 : index
    %c0_1 = arith.constant 0 : index
    %0 = vector.load %arg1[%c0, %c0_0, %c0_1] : memref<1x8x32xf32, #tpu.memory_space<vmem>>, vector<1x8x32xf32>
    %1 = vector.shape_cast %0 : vector<1x8x32xf32> to vector<8x32xf32>
    %2 = arith.mulf %1, %1 : vector<8x32xf32>
    %cst = arith.constant dense<0.000000e+00> : vector<8xf32>
    %3 = vector.multi_reduction <add>, %2, %cst [1] : vector<8x32xf32> to vector<8xf32>
    %4 = vector.shape_cast %3 : vector<8xf32> to vector<8x1xf32>
    %cst_2 = arith.constant 3.200000e+01 : f32
    %5 = vector.broadcast %cst_2 : f32 to vector<8x1xf32>
    %6 = arith.divf %4, %5 : vector<8x1xf32>
    %cst_3 = arith.constant 9.99999974E-6 : f32
    %7 = vector.broadcast %cst_3 : f32 to vector<8x1xf32>
    %8 = arith.addf %6, %7 : vector<8x1xf32>
    %9 = math.rsqrt %8 : vector<8x1xf32>
    %10 = vector.broadcast %9 : vector<8x1xf32> to vector<8x32xf32>
    %11 = arith.mulf %1, %10 : vector<8x32xf32>
    %c0_4 = arith.constant 0 : index
    %c0_5 = arith.constant 0 : index
    %12 = vector.load %arg8[%c0_4, %c0_5] : memref<1x32xf32, #tpu.memory_space<vmem>>, vector<1x32xf32>
    %13 = vector.broadcast %12 : vector<1x32xf32> to vector<8x32xf32>
    %14 = arith.mulf %11, %13 : vector<8x32xf32>
    %15 = arith.truncf %14 : vector<8x32xf32> to vector<8x32xbf16>
    %c0_6 = arith.constant 0 : index
    %c0_7 = arith.constant 0 : index
    %c0_8 = arith.constant 0 : index
    %16 = vector.load %arg2[%c0_6, %c0_7, %c0_8] : memref<1x8x8xf32, #tpu.memory_space<vmem>>, vector<1x8x8xf32>
    %17 = vector.shape_cast %16 : vector<1x8x8xf32> to vector<8x8xf32>
    %c0_9 = arith.constant 0 : index
    %c0_10 = arith.constant 0 : index
    %c0_11 = arith.constant 0 : index
    %18 = vector.load %arg3[%c0_9, %c0_10, %c0_11] : memref<1x8x8xf32, #tpu.memory_space<vmem>>, vector<1x8x8xf32>
    %19 = vector.shape_cast %18 : vector<1x8x8xf32> to vector<8x8xf32>
    %20 = tpu.iota {dimensions = array<i32: 0>} : vector<8x8xi32>
    %21 = tpu.iota {dimensions = array<i32: 1>} : vector<8x8xi32>
    %22 = arith.cmpi sle, %21, %20 : vector<8x8xi32>
    %cst_12 = arith.constant 0.000000e+00 : f32
    %23 = vector.broadcast %cst_12 : f32 to vector<8x32xf32>
    %c0_i32 = arith.constant 0 : i32
    %c4_i32 = arith.constant 4 : i32
    %24 = arith.addi %c0_i32, %c4_i32 : i32
    %c1_i32 = arith.constant 1 : i32
    %25 = scf.for %arg14 = %c0_i32 to %24 step %c1_i32 iter_args(%arg15 = %23) -> (vector<8x32xf32>)  : i32 {
      %59 = arith.index_cast %arg14 : i32 to index
      %c0_32 = arith.constant 0 : index
      %c0_33 = arith.constant 0 : index
      %60 = vector.load %arg4[%59, %c0_32, %c0_33] : memref<4x32x8xbf16, #tpu.memory_space<vmem>>, vector<1x32x8xbf16>
      %61 = vector.shape_cast %60 : vector<1x32x8xbf16> to vector<32x8xbf16>
      %cst_34 = arith.constant dense<0.000000e+00> : vector<8x8xf32>
      %62 = tpu.matmul %15, %61, %cst_34 {dimension_numbers = #tpu.dot_dimension_numbers<[1], [0], [0], [1], [0, 0, 1, 1], [], []>} : vector<8x32xbf16>, vector<32x8xbf16>, vector<8x8xf32> -> vector<8x8xf32>
      %63 = arith.index_cast %arg14 : i32 to index
      %c0_35 = arith.constant 0 : index
      %c0_36 = arith.constant 0 : index
      %64 = vector.load %arg5[%63, %c0_35, %c0_36] : memref<4x32x8xbf16, #tpu.memory_space<vmem>>, vector<1x32x8xbf16>
      %65 = vector.shape_cast %64 : vector<1x32x8xbf16> to vector<32x8xbf16>
      %cst_37 = arith.constant dense<0.000000e+00> : vector<8x8xf32>
      %66 = tpu.matmul %15, %65, %cst_37 {dimension_numbers = #tpu.dot_dimension_numbers<[1], [0], [0], [1], [0, 0, 1, 1], [], []>} : vector<8x32xbf16>, vector<32x8xbf16>, vector<8x8xf32> -> vector<8x8xf32>
      %67 = arith.index_cast %arg14 : i32 to index
      %c0_38 = arith.constant 0 : index
      %c0_39 = arith.constant 0 : index
      %68 = vector.load %arg6[%67, %c0_38, %c0_39] : memref<4x32x8xbf16, #tpu.memory_space<vmem>>, vector<1x32x8xbf16>
      %69 = vector.shape_cast %68 : vector<1x32x8xbf16> to vector<32x8xbf16>
      %cst_40 = arith.constant dense<0.000000e+00> : vector<8x8xf32>
      %70 = tpu.matmul %15, %69, %cst_40 {dimension_numbers = #tpu.dot_dimension_numbers<[1], [0], [0], [1], [0, 0, 1, 1], [], []>} : vector<8x32xbf16>, vector<32x8xbf16>, vector<8x8xf32> -> vector<8x8xf32>
      %71 = vector.extract_strided_slice %62 {offsets = [0, 4], sizes = [8, 4], strides = [1, 1]} : vector<8x8xf32> to vector<8x4xf32>
      %cst_41 = arith.constant 0.000000e+00 : f32
      %72 = vector.broadcast %cst_41 : f32 to vector<8x4xf32>
      %73 = arith.subf %72, %71 : vector<8x4xf32>
      %74 = vector.extract_strided_slice %62 {offsets = [0, 0], sizes = [8, 4], strides = [1, 1]} : vector<8x8xf32> to vector<8x4xf32>
      %75 = tpu.concatenate %73, %74 in 1 : vector<8x4xf32>, vector<8x4xf32> -> vector<8x8xf32>
      %76 = arith.mulf %62, %17 : vector<8x8xf32>
      %77 = arith.mulf %75, %19 : vector<8x8xf32>
      %78 = arith.addf %76, %77 : vector<8x8xf32>
      %79 = arith.truncf %78 : vector<8x8xf32> to vector<8x8xbf16>
      %80 = vector.extract_strided_slice %66 {offsets = [0, 4], sizes = [8, 4], strides = [1, 1]} : vector<8x8xf32> to vector<8x4xf32>
      %cst_42 = arith.constant 0.000000e+00 : f32
      %81 = vector.broadcast %cst_42 : f32 to vector<8x4xf32>
      %82 = arith.subf %81, %80 : vector<8x4xf32>
      %83 = vector.extract_strided_slice %66 {offsets = [0, 0], sizes = [8, 4], strides = [1, 1]} : vector<8x8xf32> to vector<8x4xf32>
      %84 = tpu.concatenate %82, %83 in 1 : vector<8x4xf32>, vector<8x4xf32> -> vector<8x8xf32>
      %85 = arith.mulf %66, %17 : vector<8x8xf32>
      %86 = arith.mulf %84, %19 : vector<8x8xf32>
      %87 = arith.addf %85, %86 : vector<8x8xf32>
      %88 = arith.truncf %87 : vector<8x8xf32> to vector<8x8xbf16>
      %cst_43 = arith.constant dense<0.000000e+00> : vector<8x8xf32>
      %89 = tpu.matmul %79, %88, %cst_43 {dimension_numbers = #tpu.dot_dimension_numbers<[1], [1], [0], [0], [0, 0, 1, 0], [], []>} : vector<8x8xbf16>, vector<8x8xbf16>, vector<8x8xf32> -> vector<8x8xf32>
      %cst_44 = arith.constant 0.353553385 : f32
      %90 = vector.broadcast %cst_44 : f32 to vector<8x8xf32>
      %91 = arith.mulf %89, %90 : vector<8x8xf32>
      %cst_45 = arith.constant 0xFF800000 : f32
      %92 = vector.broadcast %cst_45 : f32 to vector<8x8xf32>
      %93 = arith.select %22, %91, %92 : vector<8x8xi1>, vector<8x8xf32>
      %cst_46 = arith.constant dense<0xFF800000> : vector<8xf32>
      %94 = vector.multi_reduction <maximumf>, %93, %cst_46 [1] : vector<8x8xf32> to vector<8xf32>
      %95 = vector.shape_cast %94 : vector<8xf32> to vector<8x1xf32>
      %96 = vector.broadcast %95 : vector<8x1xf32> to vector<8x8xf32>
      %97 = arith.subf %93, %96 : vector<8x8xf32>
      %98 = math.exp %97 : vector<8x8xf32>
      %cst_47 = arith.constant dense<0.000000e+00> : vector<8xf32>
      %99 = vector.multi_reduction <add>, %98, %cst_47 [1] : vector<8x8xf32> to vector<8xf32>
      %100 = vector.shape_cast %99 : vector<8xf32> to vector<8x1xf32>
      %101 = tpu.reciprocal %100 {approx = true} : vector<8x1xf32> -> vector<8x1xf32>
      %102 = vector.broadcast %101 : vector<8x1xf32> to vector<8x8xf32>
      %103 = arith.mulf %98, %102 : vector<8x8xf32>
      %104 = arith.truncf %103 : vector<8x8xf32> to vector<8x8xbf16>
      %105 = arith.truncf %70 : vector<8x8xf32> to vector<8x8xbf16>
      %cst_48 = arith.constant dense<0.000000e+00> : vector<8x8xf32>
      %106 = tpu.matmul %104, %105, %cst_48 {dimension_numbers = #tpu.dot_dimension_numbers<[1], [0], [0], [1], [0, 0, 1, 1], [], []>} : vector<8x8xbf16>, vector<8x8xbf16>, vector<8x8xf32> -> vector<8x8xf32>
      %107 = arith.truncf %106 : vector<8x8xf32> to vector<8x8xbf16>
      %108 = arith.index_cast %arg14 : i32 to index
      %c0_49 = arith.constant 0 : index
      %c0_50 = arith.constant 0 : index
      %109 = vector.load %arg7[%108, %c0_49, %c0_50] : memref<4x8x32xbf16, #tpu.memory_space<vmem>>, vector<1x8x32xbf16>
      %110 = vector.shape_cast %109 : vector<1x8x32xbf16> to vector<8x32xbf16>
      %cst_51 = arith.constant dense<0.000000e+00> : vector<8x32xf32>
      %111 = tpu.matmul %107, %110, %cst_51 {dimension_numbers = #tpu.dot_dimension_numbers<[1], [0], [0], [1], [0, 0, 1, 1], [], []>} : vector<8x8xbf16>, vector<8x32xbf16>, vector<8x32xf32> -> vector<8x32xf32>
      %112 = arith.addf %arg15, %111 : vector<8x32xf32>
      scf.yield %112 : vector<8x32xf32>
    }
    %c4_i32_13 = arith.constant 4 : i32
    %26 = arith.addf %1, %25 : vector<8x32xf32>
    %27 = arith.mulf %26, %26 : vector<8x32xf32>
    %cst_14 = arith.constant dense<0.000000e+00> : vector<8xf32>
    %28 = vector.multi_reduction <add>, %27, %cst_14 [1] : vector<8x32xf32> to vector<8xf32>
    %29 = vector.shape_cast %28 : vector<8xf32> to vector<8x1xf32>
    %cst_15 = arith.constant 3.200000e+01 : f32
    %30 = vector.broadcast %cst_15 : f32 to vector<8x1xf32>
    %31 = arith.divf %29, %30 : vector<8x1xf32>
    %cst_16 = arith.constant 9.99999974E-6 : f32
    %32 = vector.broadcast %cst_16 : f32 to vector<8x1xf32>
    %33 = arith.addf %31, %32 : vector<8x1xf32>
    %34 = math.rsqrt %33 : vector<8x1xf32>
    %35 = vector.broadcast %34 : vector<8x1xf32> to vector<8x32xf32>
    %36 = arith.mulf %26, %35 : vector<8x32xf32>
    %c0_17 = arith.constant 0 : index
    %c0_18 = arith.constant 0 : index
    %37 = vector.load %arg9[%c0_17, %c0_18] : memref<1x32xf32, #tpu.memory_space<vmem>>, vector<1x32xf32>
    %38 = vector.broadcast %37 : vector<1x32xf32> to vector<8x32xf32>
    %39 = arith.mulf %36, %38 : vector<8x32xf32>
    %40 = arith.truncf %39 : vector<8x32xf32> to vector<8x32xbf16>
    %c0_19 = arith.constant 0 : index
    %c0_20 = arith.constant 0 : index
    %41 = vector.load %arg10[%c0_19, %c0_20] : memref<32x64xbf16, #tpu.memory_space<vmem>>, vector<32x64xbf16>
    %cst_21 = arith.constant dense<0.000000e+00> : vector<8x64xf32>
    %42 = tpu.matmul %40, %41, %cst_21 {dimension_numbers = #tpu.dot_dimension_numbers<[1], [0], [0], [1], [0, 0, 1, 1], [], []>} : vector<8x32xbf16>, vector<32x64xbf16>, vector<8x64xf32> -> vector<8x64xf32>
    %c0_22 = arith.constant 0 : index
    %c0_23 = arith.constant 0 : index
    %43 = vector.load %arg11[%c0_22, %c0_23] : memref<32x64xbf16, #tpu.memory_space<vmem>>, vector<32x64xbf16>
    %cst_24 = arith.constant dense<0.000000e+00> : vector<8x64xf32>
    %44 = tpu.matmul %40, %43, %cst_24 {dimension_numbers = #tpu.dot_dimension_numbers<[1], [0], [0], [1], [0, 0, 1, 1], [], []>} : vector<8x32xbf16>, vector<32x64xbf16>, vector<8x64xf32> -> vector<8x64xf32>
    %45 = arith.negf %42 : vector<8x64xf32>
    %46 = math.exp %45 : vector<8x64xf32>
    %cst_25 = arith.constant 1.000000e+00 : f32
    %47 = vector.broadcast %cst_25 : f32 to vector<8x64xf32>
    %48 = arith.addf %47, %46 : vector<8x64xf32>
    %49 = arith.divf %47, %48 : vector<8x64xf32>
    %50 = arith.mulf %42, %49 : vector<8x64xf32>
    %51 = arith.mulf %50, %44 : vector<8x64xf32>
    %52 = arith.truncf %51 : vector<8x64xf32> to vector<8x64xbf16>
    %c0_26 = arith.constant 0 : index
    %c0_27 = arith.constant 0 : index
    %53 = vector.load %arg12[%c0_26, %c0_27] : memref<64x32xbf16, #tpu.memory_space<vmem>>, vector<64x32xbf16>
    %cst_28 = arith.constant dense<0.000000e+00> : vector<8x32xf32>
    %54 = tpu.matmul %52, %53, %cst_28 {dimension_numbers = #tpu.dot_dimension_numbers<[1], [0], [0], [1], [0, 0, 1, 1], [], []>} : vector<8x64xbf16>, vector<64x32xbf16>, vector<8x32xf32> -> vector<8x32xf32>
    %55 = arith.addf %26, %54 : vector<8x32xf32>
    %c0_29 = arith.constant 0 : index
    %c0_30 = arith.constant 0 : index
    %c0_31 = arith.constant 0 : index
    %56 = vector.load %arg13[%c0_29, %c0_30, %c0_31] : memref<1x8x32xf32, #tpu.memory_space<vmem>>, vector<1x8x32xf32>
    %57 = vector.shape_cast %56 : vector<1x8x32xf32> to vector<8x32xf32>
    %58 = vector.shape_cast %55 : vector<8x32xf32> to vector<1x8x32xf32>
    tpu.vector_store %arg13[%c0_29, %c0_30, %c0_31], %58 {strides = array<i32>} : memref<1x8x32xf32, #tpu.memory_space<vmem>>, vector<1x8x32xf32>,
    return
  }
  func.func @transform_0(%arg0: i32) -> (i32, i32, i32) {
    %c0_i32 = arith.constant 0 : i32
    %c0_i32_0 = arith.constant 0 : i32
    %c0_i32_1 = arith.constant 0 : i32
    return %arg0, %c0_i32, %c0_i32_0 : i32, i32, i32
  }
  func.func @transform_1(%arg0: i32) -> (i32, i32, i32) {
    %c0_i32 = arith.constant 0 : i32
    %c0_i32_0 = arith.constant 0 : i32
    %c0_i32_1 = arith.constant 0 : i32
    return %arg0, %c0_i32, %c0_i32_0 : i32, i32, i32
  }
  func.func @transform_2(%arg0: i32) -> (i32, i32, i32) {
    %c0_i32 = arith.constant 0 : i32
    %c0_i32_0 = arith.constant 0 : i32
    %c0_i32_1 = arith.constant 0 : i32
    return %arg0, %c0_i32, %c0_i32_0 : i32, i32, i32
  }
  func.func @transform_3(%arg0: i32) -> (i32, i32, i32) {
    %c0_i32 = arith.constant 0 : i32
    %c0_i32_0 = arith.constant 0 : i32
    %c0_i32_1 = arith.constant 0 : i32
    %c0_i32_2 = arith.constant 0 : i32
    return %c0_i32, %c0_i32_0, %c0_i32_1 : i32, i32, i32
  }
  func.func @transform_4(%arg0: i32) -> (i32, i32, i32) {
    %c0_i32 = arith.constant 0 : i32
    %c0_i32_0 = arith.constant 0 : i32
    %c0_i32_1 = arith.constant 0 : i32
    %c0_i32_2 = arith.constant 0 : i32
    return %c0_i32, %c0_i32_0, %c0_i32_1 : i32, i32, i32
  }
  func.func @transform_5(%arg0: i32) -> (i32, i32, i32) {
    %c0_i32 = arith.constant 0 : i32
    %c0_i32_0 = arith.constant 0 : i32
    %c0_i32_1 = arith.constant 0 : i32
    %c0_i32_2 = arith.constant 0 : i32
    return %c0_i32, %c0_i32_0, %c0_i32_1 : i32, i32, i32
  }
  func.func @transform_6(%arg0: i32) -> (i32, i32, i32) {
    %c0_i32 = arith.constant 0 : i32
    %c0_i32_0 = arith.constant 0 : i32
    %c0_i32_1 = arith.constant 0 : i32
    %c0_i32_2 = arith.constant 0 : i32
    return %c0_i32, %c0_i32_0, %c0_i32_1 : i32, i32, i32
  }
  func.func @transform_7(%arg0: i32) -> (i32, i32) {
    %c0_i32 = arith.constant 0 : i32
    %c0_i32_0 = arith.constant 0 : i32
    %c0_i32_1 = arith.constant 0 : i32
    return %c0_i32, %c0_i32_0 : i32, i32
  }
  func.func @transform_8(%arg0: i32) -> (i32, i32) {
    %c0_i32 = arith.constant 0 : i32
    %c0_i32_0 = arith.constant 0 : i32
    %c0_i32_1 = arith.constant 0 : i32
    return %c0_i32, %c0_i32_0 : i32, i32
  }
  func.func @transform_9(%arg0: i32) -> (i32, i32) {
    %c0_i32 = arith.constant 0 : i32
    %c0_i32_0 = arith.constant 0 : i32
    %c0_i32_1 = arith.constant 0 : i32
    return %c0_i32, %c0_i32_0 : i32, i32
  }
  func.func @transform_10(%arg0: i32) -> (i32, i32) {
    %c0_i32 = arith.constant 0 : i32
    %c0_i32_0 = arith.constant 0 : i32
    %c0_i32_1 = arith.constant 0 : i32
    return %c0_i32, %c0_i32_0 : i32, i32
  }
  func.func @transform_11(%arg0: i32) -> (i32, i32) {
    %c0_i32 = arith.constant 0 : i32
    %c0_i32_0 = arith.constant 0 : i32
    %c0_i32_1 = arith.constant 0 : i32
    return %c0_i32, %c0_i32_0 : i32, i32
  }
  func.func @transform_12(%arg0: i32) -> (i32, i32, i32) {
    %c0_i32 = arith.constant 0 : i32
    %c0_i32_0 = arith.constant 0 : i32
    %c0_i32_1 = arith.constant 0 : i32
    return %arg0, %c0_i32, %c0_i32_0 : i32, i32, i32
  }
}

</mosaic_0001>

<bundles_post_ra>
// kernel: tpu_custom_call.1
= control target key start
LH: loop header
LB: loop body
LE: loop exit
PB: predicated region body
PF: predicated region fallthrough
CT: control target
= control target key end

     0   :  { %17 = vsyncpa [#allocation3], 0  ;;  %s1812_s0 = inlined_call_operand.vmem [shape: f32[2,8,32], index: 0, kind: input, shape index: {}]   ;;  %s1813_s1 = inlined_call_operand.vmem [shape: f32[2,8,8], index: 1, kind: input, shape index: {}]   ;;  %s1814_s2 = inlined_call_operand.vmem [shape: f32[2,8,8], index: 2, kind: input, shape index: {}]   ;;  %s1815_s3 = inlined_call_operand.vmem [shape: bf16[4,32,8], index: 3, kind: input, shape index: {}]   ;;  %s1816_s4 = inlined_call_operand.vmem [shape: bf16[4,32,8], index: 4, kind: input, shape index: {}]   ;;  %s1817_s5 = inlined_call_operand.vmem [shape: bf16[4,32,8], index: 5, kind: input, shape index: {}]   ;;  %s1818_s6 = inlined_call_operand.vmem [shape: bf16[4,8,32], index: 6, kind: input, shape index: {}]   ;;  %s1819_s7 = inlined_call_operand.vmem [shape: f32[1,32], index: 7, kind: input, shape index: {}]   ;;  %s1820_s8 = inlined_call_operand.vmem [shape: f32[1,32], index: 8, kind: input, shape index: {}]   ;;  %s1821_s9 = inlined_call_operand.vmem [shape: bf16[32,64], index: 9, kind: input, shape index: {}]   ;;  %s1822_s10 = inlined_call_operand.vmem [shape: bf16[32,64], index: 10, kind: input, shape index: {}]   ;;  %s1823_s11 = inlined_call_operand.vmem [shape: bf16[64,32], index: 11, kind: input, shape index: {}]   ;;  %s1824_s12 = inlined_call_operand.hbm [shape: f32[2,8,32], index: 12, kind: output, shape index: {}]  }
   0x1   :  { %19 = vsyncpa [#allocation3 + $0x1], 0  ;;  %s1559_s21 = smov 0   ;;  %s1561_s22 = smov 0  }
   0x2   :  { %s1563_s23 = smov 0   ;;  %s1565_s24 = smov 0  }
   0x3 LB: > { %1830 = sst [smem:[#allocation5_spill]] %s1473_s23  ;;  %s1580_s25 = sadd.s32 4294967295, %s1477_s24   ;;  %s1477_s24 = sphi %s1565_s24, %s1839_s24   ;;  %s1473_s23 = sphi %s1563_s23, %s1841_s23   ;;  %s1469_s22 = sphi %s1561_s22, %s1843_s22   ;;  %s1465_s21 = sphi %s1559_s21, %s1842_s21  }
   0x4   : > { %s1178_s26 = sadd.s32 4294967294, %s1477_s24   ;;  %s1584_s27 = sadd.s32 1, %s1477_s24  }
   0x5   : > { %1831 = sst [smem:[#allocation6_spill]] %s1584_s27  ;;  %s299_s28 = sadd.s32 1, %s1473_s23 }
   0x6   : > { %s296_s29 = ssub.s32 %s1477_s24, %s1584_s27  ;;  %p309_p0 = scmp.ne.s32.totalorder %s1473_s23, %s1469_s22 }
   0x7   : > { %p297_p1 = scmp.eq.s32.totalorder %s296_s29, 0  ;;  %p310_p2 = scmp.eq.s32.totalorder %s1580_s25, 1 }
   0x8   : > { %p315_p3 = scmp.ne.s32.totalorder %s1469_s22, %s1465_s21  ;;  %p316_p4 = scmp.eq.s32.totalorder %s1178_s26, 1 }
   0x9   : > { %s1595_s30 = scalar_select %p297_p1, %s1473_s23, %s299_s28  }
   0xa   : > { %p1597_p5 = por %p310_p2, %p309_p0  ;;  %p1601_p6 = por %p316_p4, %p315_p3 }
   0xb   : > { %1832 = sst [smem:[#allocation7_spill]] %s1595_s30  ;;  %p1181_p7 = scmp.ge.s32.totalorder %s1477_s24, 1 }
   0xc   : > { %s1834_s14 = scalar_select %p1601_p6, 1, 0 }
   0xd   : > { %p382_p8 = scmp.lt.s32.totalorder %s1477_s24, 3 }
   0xe   : > { %1835 = sst [smem:[#allocation8_spill]] %s1834_s14 }
   0xf   : > { %p383_p9 = pnand %p1181_p7, %p382_p8 }
  0x10   : > { %s1829_s15 = sand.u32 (!%p383_p9), 1, %s1469_s22   ;;  %p431_p10 = scmp.lt.s32.totalorder (!%p383_p9), %s1580_s25, 1  ;;  %vm446_vm0 = vcmask (!%p383_p9), 261120   ;;  %v466_v5 = vlaneseq (!%p383_p9)  ;;  %v1186_v12 = vld [vmem:[%s1819_s7] ss:$0 sm:$0xff] (!%p383_p9)  ;;  %v1645_v16 = vmov (!%p383_p9), 0.0  }
  0x11   : > { %386 = sbr.rel (%p383_p9) target bundleno = 2152 (0x868), region = 68  ;;  %s1611_s16 = sshll.u32 (!%p383_p9), %s1829_s15, 3 }
  0x12   : > { %v1632_v6 = vshrl.u32 (!%p383_p9), %v466_v5, 7  ;;  %v1634_v7 = vand.u32 (!%p383_p9), 127, %v466_v5 }
  0x14   : > { %vm470_vm1 = vcmp.le.s32.totalorder (!%p383_p9), %v1634_v7, %v1632_v6 }
  0x18   : > { %s432_s17 = scalar_select %p431_p10, %s1580_s25, 1 }
  0x1a   : > { %s1183_s18 = sshll.u32 %s432_s17, 3 }
  0x1b   : > { %s434_s26 = scalar_lea.vmem %s1812_s0, %s1183_s18  ;;  %s438_s30 = scalar_lea.vmem %s1813_s1, %s1183_s18 }
  0x1c   : > { %s442_s14 = scalar_lea.vmem %s1814_s2, %s1183_s18  ;;  %v1623_v0 = vld [vmem:[%s434_s26] sm:$0xff] }
  0x1d   : > { %v1625_v1 = vld [vmem:[%s438_s30] sm:$0xff]  ;;  %v445_v2 = vmul.f32 %v1623_v0, %v1623_v0  ;;  %s430_s30 = scalar_lea.vmem [#allocation2], %s1611_s16 }
  0x1e   : > { %v1629_v3 = vld [vmem:[%s442_s14] sm:$0xff]  ;;  %s1647_s14 = smov 0  }
  0x1f   : > { %v447_v4 = vsel %vm446_vm0, %v445_v2, 0.0 }
  0x20   : > { %448 = vadd.xlane.f32.xlu0 %v447_v4 }
  0xad   : > { %v449_v8 = vpop.xlane.xlu0 %448 }
  0xae   : > { %v451_v9 = vmul.f32 0.03125, %v449_v8 }
  0xb0   : > { %v452_v10 = vadd.f32 1e-05, %v451_v9 }
  0xb2   : > { %1381 = vrsqrt.f32 %v452_v10 }
  0xbc   : > { %v1382_v11 = vpop.eup %1381 }
  0xbd   : > { %v454_v13 = vmul.f32 %v1382_v11, %v1623_v0 }
  0xbf   : > { %v462_v14 = vmul.f32 %v1186_v12, %v454_v13 }
  0xc1   : > { %v1642_v15 = vpack.c.bf16 %v462_v14, %v462_v14 }
  0xc2 LB: >> { %v1487_v17 = vmov 0.0   ;;  %s1221_s17 = sshll.u32 %s1485_s14, 4  ;;  %vm1488_vm2 = vmmov 0   ;;  %s1490_s18 = smov 4   ;;  %vm665_vm3 = vcmask 31744   ;;  %vm685_vm4 = vcmask 64512   ;;  %s1485_s14 = sphi %s1647_s14, %s476_s14   ;;  %v1481_v16 = vphi %v1645_v16, %v1836_v16  }
  0xc3   : >> { %1250 = vmatprep.subr.bf16.mxu0 %v1487_v17  ;;  %1258 = vmatprep.subr.bf16.mxu1 %v1487_v17  ;;  %s480_s20 = scalar_lea.vmem %s1815_s3, %s1221_s17  ;;  %s541_s29 = scalar_lea.vmem %s1816_s4, %s1221_s17  ;;  %vm750_vm5 = vcmask 1043456  }
  0xc4   : >> { %1254 = vmatprep.mubr.msk.bf16.mxu0 %vm1488_vm2, %v1487_v17  ;;  %1262 = vmatprep.mubr.msk.bf16.mxu1 %vm1488_vm2, %v1487_v17  ;;  %v1383_v18 = vld [vmem:[%s480_s20] sm:$0xff]   ;;  %v1385_v20 = vld [vmem:[%s480_s20 + $0x8] sm:$0xff]   ;;  %s1671_s15 = scalar_lea.vmem %s1817_s5, %s1221_s17  ;;  %s1489_s17 = smov 124  }
  0xc5   : >> { %v1384_v19 = vld [vmem:[%s541_s29] sm:$0xff]   ;;  %1251 = vmatpush3.bf16.msra.mxu0 %v1383_v18  ;;  %v1386_v21 = vld [vmem:[%s541_s29 + $0x8] sm:$0xff]  }
  0xc6   : >> { %1259 = vmatpush3.bf16.msra.mxu1 %v1384_v19  ;;  %1252 = vmatprep.subr.bf16.mxu0 %v1487_v17  ;;  %v1387_v47 = vld [vmem:[%s1671_s15] sm:$0xff]   ;;  %v1388_v48 = vld [vmem:[%s1671_s15 + $0x8] sm:$0xff]   ;;  %s1202_s15 = sshll.u32 %s1485_s14, 2  ;;  %s476_s14 = sadd.s32 1, %s1485_s14  }
  0xc7   : >> { %1260 = vmatprep.subr.bf16.mxu1 %v1487_v17  ;;  %s796_s26 = scalar_lea.vmem %s1818_s6, %s1202_s15  ;;  %p473_p11 = scmp.ge.s32.totalorder %s476_s14, 4  }
  0xc8   : >> { %v797_v8 = vld [vmem:[%s796_s26] sm:$0xf]  ;;  %vm1492_vm6 = vmmov (%p473_p11), 0   ;;  %vm1019_vm7 = vcmask (%p473_p11), 523264   ;;  %s1218_s15 = sshll.u32 (%p473_p11), %s1580_s25, 7  ;;  %s1079_s19 = sshll.u32 (%p473_p11), %s430_s30, 4  ;;  %s1767_s19 = int_to_ptr.vmem [resolvable:$true] %s1079_s19 }
  0xc9   : >> { %1253 = vmatpush3.bf16.msra.mxu0 %v1385_v20  ;;  %v802_v9 = vsel %vm750_vm5, %v797_v8, 0  ;;  %s1765_s28 = scalar_lea.hbm (%p473_p11), %s1824_s12, %s1218_s15  ;;  %s1837_s25 = sand.u32 (%p473_p11), 1, %s1469_s22  }
  0xca   : >> { %1261 = vmatpush3.bf16.msra.mxu1 %v1386_v21  ;;  %1266 = vmatprep.subr.bf16.mxu0 %v1487_v17  ;;  %s1066_s29 = scalar_lea.sflag (%p473_p11), [#allocation3], %s1837_s25  ;;  %s1407_s14 = scalar_lea.vmem (%p473_p11), %s1767_s19, 128 }
  0xcb   : >> { %1274 = vmatprep.subr.bf16.mxu1 %v1487_v17  ;;  %p1408_p12 = scmp.ne.s32.totalorder (%p473_p11), %s1767_s19, %s1407_s14  ;;  %s1493_s23 = smov (%p473_p11), [#allocation2]  }
  0xcc   : >> { %1255 = vmatmul.mubr.msk.bf16.vlgmr.msra.gmra.mrb[0].mxu0 %vm446_vm0, %v1642_v15  ;;  %s1411_s27 = sshll.u32 (%p473_p11), %s1493_s23, 4  ;;  %s1412_s27 = int_to_ptr.vmem [resolvable:$false] %s1411_s27 }
  0xcd   : >> { %1263 = vmatmul.mubr.msk.bf16.vlgmr.msra.gmra.mrb[0].mxu1 %vm446_vm0, %v1642_v15  ;;  %1270 = vmatprep.mubr.msk.bf16.mxu0 %vm1488_vm2, %v1487_v17  ;;  %p1409_p13 = pnand (%p473_p11), %p1408_p12, %p1597_p5  ;;  %p1414_p1 = scmp.lt.s32.totalorder (%p473_p11), %s1767_s19, %s1412_s27 }
  0xce   : >> { %1276 = vmatprep.mubr.msk.bf16.mxu1 %vm1488_vm2, %v1487_v17  ;;  %1267 = vmatpush3.bf16.msra.mxu0 %v1387_v47 }
  0xcf   : >> { %1268 = vmatprep.subr.bf16.mxu0 %v1487_v17  ;;  %p1410_p0 = pneg (%p473_p11), %p1409_p13 }
  0xd2   : >> { %1269 = vmatpush3.bf16.msra.mxu0 %v1388_v48 }
  0xd3   : >> { %1280 = vmatprep.subr.bf16.mxu0 %v1487_v17 }
  0xd5   : >> { %1271 = vmatmul.mubr.msk.bf16.vlgmr.msra.gmra.mrb[4].mxu0 %vm446_vm0, %v1642_v15  ;;  %v1204_v15 = vld [vmem:[%s1820_s8] ss:$0 sm:$0xff] (%p473_p11) }
  0xd6   : >> { %1282 = vmatprep.mubr.msk.bf16.mxu0 %vm1488_vm2, %v1487_v17 }
 0x19f   : >> { %v534_v22 = vpop.f32.mrb[0].mxu0 }
 0x1a0   : >> { %v592_v23 = vpop.f32.mrb[0].mxu1  ;;  %v656_v24 = vsub.f32 0.0, %v534_v22  ;;  %v1256_v25 = vpop.f32.mrb[1].mxu0  ;;  %v667_v43 = vmul.f32 %v534_v22, %v1625_v1 }
 0x1a1   : >> { %v1264_v26 = vpop.f32.mrb[1].mxu1  ;;  %v671_v27 = vsub.f32 0.0, %v592_v23  ;;  %v537_v28 = vpop.f32.mrb[2].mxu0  ;;  %v681_v37 = vmul.f32 %v592_v23, %v1625_v1 }
 0x1a2   : >> { %v595_v29 = vpop.f32.mrb[2].mxu1  ;;  %658 = vrot.lane.b32.xlu1 %v656_v24, %s1489_s17  ;;  %v1257_v30 = vpop.f32.mrb[3].mxu0 }
 0x1a3   : >> { %673 = vrot.lane.b32.xlu0 %v671_v27, %s1489_s17  ;;  %v1265_v31 = vpop.f32.mrb[3].mxu1  ;;  %v1491_v29 = vmov (%p473_p11), 0.0   ;;  %s1413_s17 = scalar_lea.vmem (%p473_p11), %s1412_s27, 256 }
 0x1a4   : > { %p1415_p2 = scmp.lt.s32.totalorder (%p473_p11), %s1413_s17, %s1407_s14 }
 0x1a6   : >> { %662 = vrot.lane.b32.xlu1 %v534_v22, %s1490_s18  ;;  %p1416_p3 = por (%p473_p11), %p1415_p2, %p1414_p1 }
 0x1a7   : >> { %677 = vrot.lane.b32.xlu0 %v592_v23, %s1490_s18 }
 0x1a8   : >> { %v650_v61 = vpop.f32.mrb[4].mxu0  ;;  %p1417_p4 = pnand (%p473_p11), %p1416_p3, %p1410_p0 }
 0x1a9   : >> { %v1272_v62 = vpop.f32.mrb[5].mxu0  ;;  %v746_v4 = vpack.c.bf16 %v650_v61, %v650_v61 }
 0x1aa   : >> { %v653_v63 = vpop.f32.mrb[6].mxu0 }
 0x1ab   : >> { %v1273_v2 = vpop.f32.mrb[7].mxu0  ;;  %v752_v5 = vsel %vm750_vm5, %v746_v4, 0 }
 0x1ac   : >> { %1281 = vmatpush3.bf16.msra.mxu0 %v752_v5 }
 0x1ad   : > { %1308 = vmatprep.subr.bf16.mxu0 (%p473_p11), %v1491_v29 }
 0x214   : >> { %v659_v32 = vpop.permute.xlu1 %658 }
 0x215   : >> { %v674_v33 = vpop.permute.xlu0 %673 }
 0x218   : >> { %v663_v35 = vpop.permute.xlu1 %662 }
 0x219   : >> { %v678_v34 = vpop.permute.xlu0 %677  ;;  %v666_v39 = vsel %vm665_vm3, %v659_v32, %v663_v35  ;;  %v1395_v32 = vld [vmem:[%s1822_s10] sm:$0xff] (%p473_p11)  }
 0x21a   : >> { %v680_v36 = vsel %vm665_vm3, %v674_v33, %v678_v34  ;;  %v668_v42 = vmul.f32 %v666_v39, %v1629_v3  ;;  %v1396_v34 = vld [vmem:[%s1822_s10 + $0x8] sm:$0xff] (%p473_p11)   ;;  %v1397_v35 = vld [vmem:[%s1823_s11] sm:$0xff] (%p473_p11)  }
 0x21b   : >> { %v682_v38 = vmul.f32 %v680_v36, %v1629_v3  ;;  %v1398_v36 = vld [vmem:[%s1823_s11 + $0x8] sm:$0xff] (%p473_p11)  }
 0x21c   : >> { %v669_v45 = vadd.f32 %v668_v42, %v667_v43 }
 0x21d   : >> { %v683_v40 = vadd.f32 %v682_v38, %v681_v37  ;;  %v1399_v37 = vld [vmem:[%s1823_s11 + $0x10] sm:$0xff] (%p473_p11)   ;;  %v1400_v38 = vld [vmem:[%s1823_s11 + $0x18] sm:$0xff] (%p473_p11)  }
 0x21e   : >> { %v670_v46 = vpack.c.bf16 %v669_v45, %v669_v45 }
 0x21f   : >> { %v684_v41 = vpack.c.bf16 %v683_v40, %v683_v40 }
 0x221   : >> { %v690_v44 = vsel %vm685_vm4, %v684_v41, 0 }
 0x222   : >> { %1275 = vmatpush3.bf16.xpose.msra.mxu1 %v690_v44 }
 0x223   : >> { %1286 = vmatprep.subr.bf16.mxu1 %v1487_v17 }
 0x229   : >> { %1277 = vmatmul.mubr.msk.bf16.vlgmr.msra.gmra.mrb[4].mxu1 %vm685_vm4, %v670_v46 }
 0x22a   : >> { %1288 = vmatprep.mubr.msk.bf16.mxu1 %vm1488_vm2, %v1487_v17  ;;  %1287 = vmatpush3.bf16.msra.mxu1 %v802_v9 }
 0x22b   : > { %1292 = vmatprep.subr.bf16.mxu1 (%p473_p11), %v1491_v29 }
 0x2fc   : >> { %v726_v49 = vpop.f32.mrb[4].mxu1 }
 0x2fd   : >> { %v732_v50 = vmul.f32 0.35355338, %v726_v49  ;;  %v1278_v51 = vpop.f32.mrb[5].mxu1 }
 0x2fe   : >> { %v729_v52 = vpop.f32.mrb[6].mxu1 }
 0x2ff   : >> { %v733_v53 = vsel %vm470_vm1, %v732_v50, -inf  ;;  %v1279_v54 = vpop.f32.mrb[7].mxu1 }
 0x300   : >> { %v734_v55 = vsel %vm685_vm4, %v733_v53, -inf }
 0x301   : >> { %735 = vmax.xlane.f32.xlu0 %v734_v55 }
 0x38e   : >> { %v736_v56 = vpop.xlane.xlu0 %735 }
 0x38f   : >> { %v737_v57 = vsub.f32 %v733_v53, %v736_v56 }
 0x391   : >> { %v738_v58 = vmul.f32 1.442695, %v737_v57 }
 0x393   : >> { %1389 = vpow2.f32 %v738_v58 }
 0x39d   : >> { %v1390_v59 = vpop.eup %1389 }
 0x39e   : >> { %v740_v60 = vsel %vm685_vm4, %v1390_v59, 0.0 }
 0x39f   : >> { %741 = vadd.xlane.f32.xlu1 %v740_v60 }
 0x42c   : >> { %v742_v10 = vpop.xlane.xlu1 %741 }
 0x42d   : >> { %1391 = vrcp.f32 %v742_v10 }
 0x437   : >> { %v1392_v11 = vpop.eup %1391 }
 0x438   : >> { %v744_v12 = vmul.f32 %v1392_v11, %v1390_v59 }
 0x43a   : >> { %v745_v13 = vpack.c.bf16 %v744_v12, %v744_v12 }
 0x43c   : >> { %1283 = vmatmul.mubr.msk.bf16.vlgmr.msra.gmra.mrb[8].mxu0 %vm685_vm4, %v745_v13 }
 0x43d   : > { %1316 = vmatprep.mubr.msk.bf16.mxu0 (%p473_p11), %vm1492_vm6, %v1491_v29  ;;  %1309 = vmatpush3.bf16.msra.mxu0 (%p473_p11), %v1397_v35 }
 0x43e   : > { %1310 = vmatprep.subr.bf16.mxu0 (%p473_p11), %v1491_v29 }
 0x441   : > { %1311 = vmatpush3.bf16.msra.mxu0 (%p473_p11), %v1398_v36 }
 0x442   : > { %1312 = vmatprep.subr.bf16.mxu0 (%p473_p11), %v1491_v29 }
 0x445   : > { %1313 = vmatpush3.bf16.msra.mxu0 (%p473_p11), %v1399_v37 }
 0x446   : > { %1314 = vmatprep.subr.bf16.mxu0 (%p473_p11), %v1491_v29 }
 0x449   : > { %1315 = vmatpush3.bf16.msra.mxu0 (%p473_p11), %v1400_v38 }
 0x50f   : >> { %v788_v14 = vpop.f32.mrb[8].mxu0 }
 0x510   : >> { %v794_v17 = vpack.c.bf16 %v788_v14, %v788_v14  ;;  %v1284_v18 = vpop.f32.mrb[9].mxu0 }
 0x511   : >> { %v791_v19 = vpop.f32.mrb[10].mxu0 }
 0x512   : >> { %v1285_v20 = vpop.f32.mrb[11].mxu0  ;;  %1289 = vmatmul.mubr.msk.bf16.vlgmr.msra.gmra.mrb[8].mxu1 %vm685_vm4, %v794_v17 }
 0x513   : > { %1296 = vmatprep.mubr.msk.bf16.mxu1 (%p473_p11), %vm1492_vm6, %v1491_v29 }
 0x5e2   : > { %475 = sbr.rel (!%p473_p11) target bundleno = 194 (0xc2), region = 120 }
 0x5e5   : >> { %v838_v21 = vpop.f32.mrb[8].mxu1 }
 0x5e6   : >> { %v844_v22 = vadd.f32 %v1481_v16, %v838_v21   ;;  %v1290_v23 = vpop.f32.mrb[9].mxu1 }
 0x5e7   : >> { %v841_v24 = vpop.f32.mrb[10].mxu1 }
 0x5e8   : >> { %v1291_v25 = vpop.f32.mrb[11].mxu1  ;;  %v1836_v16 = vmov %v844_v22  ;;  %v1720_v26 = vadd.f32 (%p473_p11), %v844_v22, %v1623_v0  ;;  %v1394_v0 = vld [vmem:[%s1821_s9 + $0x8] sm:$0xff] (%p473_p11)  }
 0x5e9   : > { %v1393_v16 = vld [vmem:[%s1821_s9] sm:$0xff]  }
 0x5ea   : > { %v846_v27 = vmul.f32 %v1720_v26, %v1720_v26  ;;  %1293 = vmatpush3.bf16.msra.mxu1 %v1393_v16 }
 0x5eb   : > { %1294 = vmatprep.subr.bf16.mxu1 %v1491_v29 }
 0x5ec   : > { %v847_v28 = vsel %vm446_vm0, %v846_v27, 0.0 }
 0x5ed   : > { %848 = vadd.xlane.f32.xlu0 %v847_v28 }
 0x5ee   : > { %1295 = vmatpush3.bf16.msra.mxu1 %v1394_v0 }
 0x5ef   : > { %1300 = vmatprep.subr.bf16.mxu1 %v1491_v29 }
 0x67a   : > { %v849_v1 = vpop.xlane.xlu0 %848 }
 0x67b   : > { %v850_v3 = vmul.f32 0.03125, %v849_v1 }
 0x67d   : > { %v851_v6 = vadd.f32 1e-05, %v850_v3 }
 0x67f   : > { %1401 = vrsqrt.f32 %v851_v6 }
 0x689   : > { %v1402_v7 = vpop.eup %1401 }
 0x68a   : > { %v853_v30 = vmul.f32 %v1402_v7, %v1720_v26 }
 0x68c   : > { %v861_v31 = vmul.f32 %v1204_v15, %v853_v30 }
 0x68e   : > { %v862_v33 = vpack.c.bf16 %v861_v31, %v861_v31 }
 0x690   : > { %1297 = vmatmul.mubr.msk.bf16.vlgmr.msra.gmra.mrb[0].mxu1 %vm446_vm0, %v862_v33 }
 0x691   : > { %1301 = vmatpush3.bf16.msra.mxu1 %v1395_v32  ;;  %1304 = vmatprep.mubr.msk.bf16.mxu1 %vm1492_vm6, %v1491_v29 }
 0x692   : > { %1302 = vmatprep.subr.bf16.mxu1 %v1491_v29 }
 0x695   : > { %1303 = vmatpush3.bf16.msra.mxu1 %v1396_v34 }
 0x698   : > { %1305 = vmatmul.mubr.msk.bf16.vlgmr.msra.gmra.mrb[4].mxu1 %vm446_vm0, %v862_v33 }
 0x763   : > { %v916_v39 = vpop.f32.mrb[0].mxu1 }
 0x764   : > { %v1211_v40 = vmul.f32 -1.442695, %v916_v39  ;;  %v1298_v41 = vpop.f32.mrb[1].mxu1 }
 0x765   : > { %v919_v42 = vpop.f32.mrb[2].mxu1 }
 0x766   : > { %1403 = vpow2.f32 %v1211_v40  ;;  %v1299_v43 = vpop.f32.mrb[3].mxu1 }
 0x76b   : > { %v972_v44 = vpop.f32.mrb[4].mxu1 }
 0x76c   : > { %v1306_v45 = vpop.f32.mrb[5].mxu1 }
 0x76d   : > { %v975_v46 = vpop.f32.mrb[6].mxu1 }
 0x76e   : > { %v1307_v47 = vpop.f32.mrb[7].mxu1 }
 0x770   : > { %v1404_v48 = vpop.eup %1403 }
 0x771   : > { %v981_v49 = vadd.f32 1.0, %v1404_v48 }
 0x773   : > { %1405 = vrcp.f32 %v981_v49 }
 0x77d   : > { %v1406_v50 = vpop.eup %1405 }
 0x77e   : > { %v984_v51 = vmul.f32 %v1406_v50, %v916_v39 }
 0x780   : > { %v985_v52 = vmul.f32 %v984_v51, %v972_v44 }
 0x782   : > { %v986_v53 = vpack.c.bf16 %v985_v52, %v985_v52 }
 0x784   : > { %1317 = vmatmul.mubr.msk.bf16.vlgmr.msra.gmra.mrb[0].mxu0 %vm1019_vm7, %v986_v53 }
 0x857   : > { %v1057_v54 = vpop.f32.mrb[0].mxu0 }
 0x858   : > { %v1063_v55 = vadd.f32 %v1057_v54, %v1720_v26  ;;  %v1318_v56 = vpop.f32.mrb[1].mxu0 }
 0x859   : > { %v1060_v57 = vpop.f32.mrb[2].mxu0 }
 0x85a   : > { %1064 = vst.msk [vmem:[%s430_s30] sm:$0xff] %vm446_vm0, %v1063_v55  ;;  %v1319_v58 = vpop.f32.mrb[3].mxu0 }
 0x85b   : > { %1420 = shalt.err (!%p1417_p4)
}
 0x85c   : > { %s1421_s16 = scalar_lea.hbm %s1765_s28, 128  ;;  %s1425_s15 = scalar_lea.hbm %s1824_s12, 256 }
 0x85d   : > { %p1422_p7 = scmp.ne.s32.totalorder %s1765_s28, %s1421_s16  ;;  %p1426_p10 = scmp.lt.u32.totalorder %s1765_s28, %s1824_s12 }
 0x85e   : > { %p1427_p11 = scmp.lt.u32.totalorder %s1425_s15, %s1421_s16  ;;  %p1429_p13 = scmp.lt.u32.totalorder %s1421_s16, %s1765_s28 }
 0x85f   : > { %p1423_p8 = pnand %p1422_p7, %p1597_p5 }
 0x860   : > { %p1428_p12 = por %p1427_p11, %p1426_p10 }
 0x861   : > { %p1424_p9 = pneg %p1423_p8 }
 0x862   : > { %p1430_p0 = por %p1429_p13, %p1428_p12 }
 0x864   : > { %p1431_p1 = pnand %p1430_p0, %p1424_p9 }
 0x866   : > { %1434 = shalt.err (!%p1431_p1)
}
 0x867   : > { %1320 = dma.vmem_to_hbm [thread:$0]  (%p1597_p5), %s1767_s19, 128, %s1765_s28, %s1066_s29  }
 0x868 PF: > { %p1326_p2 = scmp.ge.s32.totalorder %s1477_s24, 2  ;;  %s1091_s14 = sand.u32 1, %s1465_s21  }
 0x869   : > { %s1092_s23 = scalar_lea.sflag [#allocation3], %s1091_s14 }
 0x86a   : > { %p1323_p3 = pnand %p1326_p2, %p1601_p6 }
 0x86c   : > { %1460 = dma.done.wait (!%p1323_p3), %s1092_s23, 128  }
 0x86d   : > { %1462 = vsyncadd (!%p1323_p3), %s1092_s23, 4294967168  ;;  %s1839_s24 = sld [smem:[#allocation6_spill]]  ;;  %s1840_s27 = sld [smem:[#allocation5_spill]] }
 0x86e   : > { %s1841_s23 = sld [smem:[#allocation7_spill]]  ;;  %s1842_s21 = smov %s1469_s22 }
 0x873   : > { %p22_p4 = scmp.ge.s32.totalorder %s1839_s24, 4   ;;  %s1843_s22 = smov %s1840_s27 }
 0x875   :  { %24 = sbr.rel (!%p22_p4) target bundleno = 3 (0x3), region = 131 }
 0x87c   :  { %1097 = vsyncpa [#allocation3], 1 }
 0x87d   :  { %1099 = vsyncpa [#allocation3 + $0x1], 1 }

</bundles_post_ra>
